<compile_context>
chip_gen: v7x
topology: tpu7x:2x2x1
jax: 0.10.0
libtpu: 0.0.40
codegen_flags: <defaults>
</compile_context>

<pallas_src>
import functools

import numpy as np
import jax
import jax.numpy as jnp
from jax.experimental import pallas as pl
from jax.experimental.pallas import tpu as pltpu


def _round_up(x, m):
    return (x + m - 1) // m * m


def _dwconv_kernel(xm_ref, xh_ref, w_ref, o_ref, xpad_ref, *, taps, strip):
    # xm_ref:   (R, Tt)   this T tile of the left-padded signal
    # xh_ref:   (R, H)    the next H lanes (right halo, H >= K-1, 128-aligned)
    # w_ref:    (R, K)    per-row taps (row r holds taps of channel r % C)
    # o_ref:    (R, Tt)   output tile
    # xpad_ref: (R, Tt+H) VMEM scratch: [tile | halo], contiguous & aligned
    Tt = o_ref.shape[1]
    H = xh_ref.shape[1]

    # Stitch [tile | right halo] once (aligned stores); all halo zeros come
    # from the wrapper's padding, so no masking is needed anywhere below.
    xpad_ref[:, :Tt] = xm_ref[...]
    xpad_ref[:, Tt:Tt + H] = xh_ref[...]

    # Strip-fused tap loop: the accumulator for each lane strip stays in
    # vregs across all K taps; each tap is one (shifted) VMEM load + MAC.
    # TODO(synk): for very long TDFs (K in the 100s-1000s) switch this to a
    # lax.fori_loop over taps (unroll=8) to bound code size / compile time.
    for s0 in range(0, Tt, strip):
        sw = min(strip, Tt - s0)
        acc = (xpad_ref[:, s0:s0 + sw].astype(jnp.float32)
               * w_ref[:, 0:1].astype(jnp.float32))
        for k in range(1, taps):
            acc = acc + (xpad_ref[:, s0 + k:s0 + k + sw].astype(jnp.float32)
                         * w_ref[:, k:k + 1].astype(jnp.float32))
        o_ref[:, s0:s0 + sw] = acc.astype(o_ref.dtype)


def conv1d_depthwise_same(x, tdf, *, t_tile=None, row_tile=None):
    """Equivalent of F.conv1d(X, tdf, groups=num_channels, padding='same')."""
    B, C, T = x.shape
    assert tdf.shape[0] == C and tdf.shape[1] == 1
    K = int(tdf.shape[-1])
    # PyTorch 'same': total = K-1, left = total // 2, extra goes on the right.
    left = (K - 1) // 2

    rows = B * C
    rows_p = _round_up(rows, 8)              # fill the f32 sublane tile

    if row_tile is None:
        if rows_p <= 32:
            row_tile = rows_p
        elif rows_p % 32 == 0:
            row_tile = 32
        elif rows_p % 16 == 0:
            row_tile = 16
        else:
            row_tile = 8
    assert rows_p % row_tile == 0 and row_tile % 8 == 0

    halo = _round_up(max(K - 1, 1), 128)     # right-halo lanes (128-aligned)
    if t_tile is None:
        t_tile = min(_round_up(T, 128), 4096)
    t_tile = max(_round_up(t_tile, halo), halo)   # halo view must tile t_tile
    n_t = pl.cdiv(T, t_tile)
    t_work = n_t * t_tile
    ratio = t_tile // halo

    # Lane-aligned padded layout: `left` zeros prepended (torch 'same' left
    # padding) and a zero tail wide enough that the last tile's right halo is
    # in bounds.  Every in-kernel copy / store is then 128-lane aligned.
    w_in = t_work + halo
    x2 = x.reshape(rows, T)
    xp = jnp.pad(x2, ((0, rows_p - rows), (left, w_in - left - T)))

    # Per-row taps.  NOTE: duplicating the (C, K) taps across the batch costs
    # (B-1)*C*K*4 bytes of HBM -- negligible next to the signal traffic for
    # whitening-scale workloads (and tiny here).
    w2 = jnp.tile(tdf[:, 0, :], (B, 1))
    w2 = jnp.pad(w2, ((0, rows_p - rows), (0, 0)))

    # Strip width: keep the per-strip f32 accumulator vreg-resident (~8 vregs).
    strip = max(128, min(t_tile, (8192 // row_tile) // 128 * 128))

    grid = (rows_p // row_tile, n_t)

    out = pl.pallas_call(
        functools.partial(_dwconv_kernel, taps=K, strip=strip),
        out_shape=jax.ShapeDtypeStruct((rows_p, t_work), x.dtype),
        grid=grid,
        in_specs=[
            pl.BlockSpec((row_tile, t_tile), lambda r, t: (r, t)),            # tile
            pl.BlockSpec((row_tile, halo), lambda r, t: (r, (t + 1) * ratio)),  # halo
            pl.BlockSpec((row_tile, K), lambda r, t: (r, 0)),                 # taps
        ],
        out_specs=pl.BlockSpec((row_tile, t_tile), lambda r, t: (r, t)),
        scratch_shapes=[pltpu.VMEM((row_tile, t_tile + halo), x.dtype)],
        compiler_params=pltpu.CompilerParams(
            dimension_semantics=("parallel", "parallel"),
            vmem_limit_bytes=32 * 1024 * 1024,
        ),
    )(xp, xp, w2)

    return out[:rows, :T].reshape(B, C, T)


def _reference(x, tdf):
    # Pure-numpy cross-correlation reference (matches torch conv1d 'same').
    x = np.asarray(x, dtype=np.float64)
    tdf = np.asarray(tdf, dtype=np.float64)
    B, C, T = x.shape
    K = tdf.shape[-1]
    total = K - 1
    left = total // 2
    right = total - left
    xp = np.pad(x, ((0, 0), (0, 0), (left, right)))
    out = np.zeros((B, C, T), dtype=np.float64)
    for k in range(K):
        out += xp[:, :, k:k + T] * tdf[:, 0, k][None, :, None]
    return out


if __name__ == "__main__":
    key = jax.random.PRNGKey(0)

    # (B, C, T, K, t_tile): odd/even K, rows not multiple of 8, T not multiple
    # of 128, multiple T tiles (halo stitching), multiple row tiles, K-1 > 128.
    tests = [
        (2, 4, 128, 9, None),
        (2, 4, 128, 8, None),
        (3, 5, 128, 7, None),
        (2, 3, 200, 5, None),
        (1, 2, 1024, 13, 256),
        (7, 5, 256, 6, None),
        (2, 3, 256, 131, None),
    ]

    for (B, C, T, K, tt) in tests:
        kx, kw, key = jax.random.split(key, 3)
        X = jax.random.normal(kx, (B, C, T), dtype=jnp.float32)
        tdf = jax.random.normal(kw, (C, 1, K), dtype=jnp.float32) * 0.1

        out = conv1d_depthwise_same(X, tdf, t_tile=tt)
        out = jax.block_until_ready(out)

        ref = _reference(X, tdf)
        np.testing.assert_allclose(np.asarray(out), ref, rtol=1e-4, atol=1e-4)

    print("KERNEL_OK")
</pallas_src>

<mosaic_0001>
module attributes {stable_mosaic.version = 11 : i64} {
  func.func @_dwconv_kernel(%arg0: i32, %arg1: i32, %arg2: memref<8x128xf32, #tpu.memory_space<vmem>>, %arg3: memref<8x128xf32, #tpu.memory_space<vmem>>, %arg4: memref<8x9xf32, #tpu.memory_space<vmem>>, %arg5: memref<8x128xf32, #tpu.memory_space<vmem>>, %arg6: memref<8x256xf32, #tpu.memory_space<vmem>>) attributes {dimension_semantics = [#tpu.dimension_semantics<parallel>, #tpu.dimension_semantics<parallel>], iteration_bounds = array<i64: 1, 1>, scalar_prefetch = 0 : i64, scratch_operands = 1 : i64, tpu.core_type = #tpu.core_type<tc>, window_params = [{transform_indices = @transform_0, window_bounds = array<i64: 8, 128>}, {transform_indices = @transform_1, window_bounds = array<i64: 8, 128>}, {transform_indices = @transform_2, window_bounds = array<i64: 8, 9>}, {transform_indices = @transform_3, window_bounds = array<i64: 8, 128>}]} {
    %c0 = arith.constant 0 : index
    %c0_0 = arith.constant 0 : index
    %0 = vector.load %arg2[%c0, %c0_0] : memref<8x128xf32, #tpu.memory_space<vmem>>, vector<8x128xf32>
    %c0_1 = arith.constant 0 : index
    %c0_2 = arith.constant 0 : index
    %1 = vector.load %arg6[%c0_1, %c0_2] : memref<8x256xf32, #tpu.memory_space<vmem>>, vector<8x128xf32>
    tpu.vector_store %arg6[%c0_1, %c0_2], %0 {strides = array<i32>} : memref<8x256xf32, #tpu.memory_space<vmem>>, vector<8x128xf32>,
    %c0_3 = arith.constant 0 : index
    %c0_4 = arith.constant 0 : index
    %2 = vector.load %arg3[%c0_3, %c0_4] : memref<8x128xf32, #tpu.memory_space<vmem>>, vector<8x128xf32>
    %c0_5 = arith.constant 0 : index
    %c128 = arith.constant 128 : index
    %3 = vector.load %arg6[%c0_5, %c128] : memref<8x256xf32, #tpu.memory_space<vmem>>, vector<8x128xf32>
    tpu.vector_store %arg6[%c0_5, %c128], %2 {strides = array<i32>} : memref<8x256xf32, #tpu.memory_space<vmem>>, vector<8x128xf32>,
    %c0_6 = arith.constant 0 : index
    %c0_7 = arith.constant 0 : index
    %4 = vector.load %arg6[%c0_6, %c0_7] : memref<8x256xf32, #tpu.memory_space<vmem>>, vector<8x128xf32>
    %c0_8 = arith.constant 0 : index
    %c0_9 = arith.constant 0 : index
    %5 = vector.load %arg4[%c0_8, %c0_9] : memref<8x9xf32, #tpu.memory_space<vmem>>, vector<8x1xf32>
    %6 = vector.broadcast %5 : vector<8x1xf32> to vector<8x128xf32>
    %7 = arith.mulf %4, %6 : vector<8x128xf32>
    %c0_10 = arith.constant 0 : index
    %c1 = arith.constant 1 : index
    %8 = vector.load %arg6[%c0_10, %c1] : memref<8x256xf32, #tpu.memory_space<vmem>>, vector<8x128xf32>
    %c0_11 = arith.constant 0 : index
    %c1_12 = arith.constant 1 : index
    %9 = vector.load %arg4[%c0_11, %c1_12] : memref<8x9xf32, #tpu.memory_space<vmem>>, vector<8x1xf32>
    %10 = vector.broadcast %9 : vector<8x1xf32> to vector<8x128xf32>
    %11 = arith.mulf %8, %10 : vector<8x128xf32>
    %12 = arith.addf %7, %11 : vector<8x128xf32>
    %c0_13 = arith.constant 0 : index
    %c2 = arith.constant 2 : index
    %13 = vector.load %arg6[%c0_13, %c2] : memref<8x256xf32, #tpu.memory_space<vmem>>, vector<8x128xf32>
    %c0_14 = arith.constant 0 : index
    %c2_15 = arith.constant 2 : index
    %14 = vector.load %arg4[%c0_14, %c2_15] : memref<8x9xf32, #tpu.memory_space<vmem>>, vector<8x1xf32>
    %15 = vector.broadcast %14 : vector<8x1xf32> to vector<8x128xf32>
    %16 = arith.mulf %13, %15 : vector<8x128xf32>
    %17 = arith.addf %12, %16 : vector<8x128xf32>
    %c0_16 = arith.constant 0 : index
    %c3 = arith.constant 3 : index
    %18 = vector.load %arg6[%c0_16, %c3] : memref<8x256xf32, #tpu.memory_space<vmem>>, vector<8x128xf32>
    %c0_17 = arith.constant 0 : index
    %c3_18 = arith.constant 3 : index
    %19 = vector.load %arg4[%c0_17, %c3_18] : memref<8x9xf32, #tpu.memory_space<vmem>>, vector<8x1xf32>
    %20 = vector.broadcast %19 : vector<8x1xf32> to vector<8x128xf32>
    %21 = arith.mulf %18, %20 : vector<8x128xf32>
    %22 = arith.addf %17, %21 : vector<8x128xf32>
    %c0_19 = arith.constant 0 : index
    %c4 = arith.constant 4 : index
    %23 = vector.load %arg6[%c0_19, %c4] : memref<8x256xf32, #tpu.memory_space<vmem>>, vector<8x128xf32>
    %c0_20 = arith.constant 0 : index
    %c4_21 = arith.constant 4 : index
    %24 = vector.load %arg4[%c0_20, %c4_21] : memref<8x9xf32, #tpu.memory_space<vmem>>, vector<8x1xf32>
    %25 = vector.broadcast %24 : vector<8x1xf32> to vector<8x128xf32>
    %26 = arith.mulf %23, %25 : vector<8x128xf32>
    %27 = arith.addf %22, %26 : vector<8x128xf32>
    %c0_22 = arith.constant 0 : index
    %c5 = arith.constant 5 : index
    %28 = vector.load %arg6[%c0_22, %c5] : memref<8x256xf32, #tpu.memory_space<vmem>>, vector<8x128xf32>
    %c0_23 = arith.constant 0 : index
    %c5_24 = arith.constant 5 : index
    %29 = vector.load %arg4[%c0_23, %c5_24] : memref<8x9xf32, #tpu.memory_space<vmem>>, vector<8x1xf32>
    %30 = vector.broadcast %29 : vector<8x1xf32> to vector<8x128xf32>
    %31 = arith.mulf %28, %30 : vector<8x128xf32>
    %32 = arith.addf %27, %31 : vector<8x128xf32>
    %c0_25 = arith.constant 0 : index
    %c6 = arith.constant 6 : index
    %33 = vector.load %arg6[%c0_25, %c6] : memref<8x256xf32, #tpu.memory_space<vmem>>, vector<8x128xf32>
    %c0_26 = arith.constant 0 : index
    %c6_27 = arith.constant 6 : index
    %34 = vector.load %arg4[%c0_26, %c6_27] : memref<8x9xf32, #tpu.memory_space<vmem>>, vector<8x1xf32>
    %35 = vector.broadcast %34 : vector<8x1xf32> to vector<8x128xf32>
    %36 = arith.mulf %33, %35 : vector<8x128xf32>
    %37 = arith.addf %32, %36 : vector<8x128xf32>
    %c0_28 = arith.constant 0 : index
    %c7 = arith.constant 7 : index
    %38 = vector.load %arg6[%c0_28, %c7] : memref<8x256xf32, #tpu.memory_space<vmem>>, vector<8x128xf32>
    %c0_29 = arith.constant 0 : index
    %c7_30 = arith.constant 7 : index
    %39 = vector.load %arg4[%c0_29, %c7_30] : memref<8x9xf32, #tpu.memory_space<vmem>>, vector<8x1xf32>
    %40 = vector.broadcast %39 : vector<8x1xf32> to vector<8x128xf32>
    %41 = arith.mulf %38, %40 : vector<8x128xf32>
    %42 = arith.addf %37, %41 : vector<8x128xf32>
    %c0_31 = arith.constant 0 : index
    %c8 = arith.constant 8 : index
    %43 = vector.load %arg6[%c0_31, %c8] : memref<8x256xf32, #tpu.memory_space<vmem>>, vector<8x128xf32>
    %c0_32 = arith.constant 0 : index
    %c8_33 = arith.constant 8 : index
    %44 = vector.load %arg4[%c0_32, %c8_33] : memref<8x9xf32, #tpu.memory_space<vmem>>, vector<8x1xf32>
    %45 = vector.broadcast %44 : vector<8x1xf32> to vector<8x128xf32>
    %46 = arith.mulf %43, %45 : vector<8x128xf32>
    %47 = arith.addf %42, %46 : vector<8x128xf32>
    %c0_34 = arith.constant 0 : index
    %c0_35 = arith.constant 0 : index
    %48 = vector.load %arg5[%c0_34, %c0_35] : memref<8x128xf32, #tpu.memory_space<vmem>>, vector<8x128xf32>
    tpu.vector_store %arg5[%c0_34, %c0_35], %47 {strides = array<i32>} : memref<8x128xf32, #tpu.memory_space<vmem>>, vector<8x128xf32>,
    return
  }
  func.func @transform_0(%arg0: i32, %arg1: i32) -> (i32, i32) {
    %c0_i32 = arith.constant 0 : i32
    return %arg0, %arg1 : i32, i32
  }
  func.func @transform_1(%arg0: i32, %arg1: i32) -> (i32, i32) {
    %c1_i32 = arith.constant 1 : i32
    %0 = arith.addi %arg1, %c1_i32 : i32
    %c1_i32_0 = arith.constant 1 : i32
    %1 = arith.muli %0, %c1_i32_0 : i32
    %c0_i32 = arith.constant 0 : i32
    return %arg0, %1 : i32, i32
  }
  func.func @transform_2(%arg0: i32, %arg1: i32) -> (i32, i32) {
    %c0_i32 = arith.constant 0 : i32
    %c0_i32_0 = arith.constant 0 : i32
    return %arg0, %c0_i32 : i32, i32
  }
  func.func @transform_3(%arg0: i32, %arg1: i32) -> (i32, i32) {
    %c0_i32 = arith.constant 0 : i32
    return %arg0, %arg1 : i32, i32
  }
}

</mosaic_0001>

<bundles_post_ra>
// kernel: tpu_custom_call.1
= control target key start
LH: loop header
LB: loop body
LE: loop exit
PB: predicated region body
PF: predicated region fallthrough
CT: control target
= control target key end

     0   :  { %8 = vsyncpa [#allocation4], 0  ;;  %s431_s0 = inlined_call_operand.hbm [shape: f32[8,256], index: 0, kind: input, shape index: {}]   ;;  %s432_s1 = inlined_call_operand.hbm [shape: f32[8,256], index: 1, kind: input, shape index: {}]   ;;  %s433_s2 = inlined_call_operand.hbm [shape: f32[8,9], index: 2, kind: input, shape index: {}]   ;;  %s434_s3 = inlined_call_operand.hbm [shape: f32[8,128], index: 3, kind: output, shape index: {}]  }
   0x1   :  { %9 = vsyncpa [#allocation7], 0  ;;  %s213_s14 = scalar_lea.hbm %s432_s1, 128 }
   0x2   :  { %10 = vsyncpa [#allocation5], 0  ;;  %s342_s15 = smov [#allocation6]   ;;  %s343_s17 = smov [#allocation3]  }
   0x3   :  { %s30_s16 = sshll.u32 %s342_s15, 4  ;;  %s17_s18 = sshll.u32 %s343_s17, 4  ;;  %s31_s16 = int_to_ptr.vmem [resolvable:$true] %s30_s16  ;;  %s18_s18 = int_to_ptr.vmem [resolvable:$true] %s17_s18 }
   0x4   :  { %s269_s21 = scalar_lea.hbm %s432_s1, 256  ;;  %p248_p1 = scmp.lt.u32.totalorder %s213_s14, %s432_s1 }
   0x5   :  { %p246_p0 = scmp.ne.s32.totalorder %s213_s14, %s269_s21  ;;  %p249_p2 = scmp.lt.u32.totalorder %s269_s21, %s269_s21 }
   0x6   :  { %p251_p4 = scmp.lt.u32.totalorder %s269_s21, %s213_s14 }
   0x7   :  { %p250_p3 = por %p249_p2, %p248_p1 }
   0x9   :  { %p252_p5 = por %p251_p4, %p250_p3 }
   0xb   :  { %p253_p6 = pnand %p252_p5, %p246_p0 }
   0xd   :  { %256 = shalt.err (!%p253_p6)
}
   0xe   :  { %s257_s24 = scalar_lea.vmem %s31_s16, 128  ;;  %p262_p8 = scmp.lt.s32.totalorder %s31_s16, %s31_s16 }
   0xf   :  { %p258_p7 = scmp.ne.s32.totalorder %s31_s16, %s257_s24  ;;  %p263_p9 = scmp.lt.s32.totalorder %s257_s24, %s257_s24 }
  0x11   :  { %p264_p10 = por %p263_p9, %p262_p8 }
  0x13   :  { %p265_p11 = pnand %p264_p10, %p258_p7 }
  0x15   :  { %268 = shalt.err (!%p265_p11)
}
  0x16   :  { %33 = dma.hbm_to_vmem [thread:$0]  %s213_s14, 128, %s31_s16, [#allocation7]  }
  0x17   :  { %s270_s27 = scalar_lea.hbm %s431_s0, 128  ;;  %s272_s4 = scalar_lea.hbm %s431_s0, 256 }
  0x18   :  { %p271_p12 = scmp.ne.s32.totalorder %s431_s0, %s270_s27  ;;  %p273_p13 = scmp.lt.u32.totalorder %s272_s4, %s270_s27 }
  0x19   :  { %p274_p0 = scmp.lt.u32.totalorder %s270_s27, %s431_s0 }
  0x1b   :  { %p275_p1 = por %p274_p0, %p273_p13 }
  0x1d   :  { %p276_p2 = pnand %p275_p1, %p271_p12 }
  0x1f   :  { %279 = shalt.err (!%p276_p2)
}
  0x20   :  { %s280_s7 = scalar_lea.vmem %s18_s18, 128  ;;  %p285_p4 = scmp.lt.s32.totalorder %s18_s18, %s18_s18 }
  0x21   :  { %p281_p3 = scmp.ne.s32.totalorder %s18_s18, %s280_s7  ;;  %p286_p5 = scmp.lt.s32.totalorder %s280_s7, %s280_s7 }
  0x23   :  { %p287_p6 = por %p286_p5, %p285_p4 }
  0x25   :  { %p288_p7 = pnand %p287_p6, %p281_p3 }
  0x27   :  { %291 = shalt.err (!%p288_p7)
}
  0x28   :  { %20 = dma.hbm_to_vmem [thread:$0]  %s431_s0, 128, %s18_s18, [#allocation4]  }
  0x29   :  { %s344_s10 = smov [#allocation8]   ;;  %s292_s14 = scalar_lea.hbm %s433_s2, 128 }
  0x2a   :  { %s40_s11 = sshll.u32 %s344_s10, 4  ;;  %p293_p8 = scmp.ne.s32.totalorder %s433_s2, %s292_s14  ;;  %s41_s11 = int_to_ptr.vmem [resolvable:$true] %s40_s11 }
  0x2b   :  { %p296_p9 = scmp.lt.u32.totalorder %s292_s14, %s433_s2 }
  0x2d   :  { %p298_p10 = pnand %p296_p9, %p293_p8 }
  0x2f   :  { %301 = shalt.err (!%p298_p10)
}
  0x30   :  { %s302_s20 = scalar_lea.vmem %s41_s11, 128  ;;  %p307_p12 = scmp.lt.s32.totalorder %s41_s11, %s41_s11 }
  0x31   :  { %p303_p11 = scmp.ne.s32.totalorder %s41_s11, %s302_s20  ;;  %p308_p13 = scmp.lt.s32.totalorder %s302_s20, %s302_s20 }
  0x33   :  { %p309_p0 = por %p308_p13, %p307_p12 }
  0x35   :  { %p310_p1 = pnand %p309_p0, %p303_p11 }
  0x37   :  { %313 = shalt.err (!%p310_p1)
}
  0x38   :  { %43 = dma.hbm_to_vmem [thread:$0]  %s433_s2, 128, %s41_s11, [#allocation7]  }
  0x39   :  { %336 = dma.done.wait [#allocation4], 128  }
  0x3a   :  { %337 = vsyncadd [#allocation4], 4294967168 }
  0x3b   :  { %338 = dma.done.wait [#allocation7], 256  }
  0x3c   :  { %339 = vsyncadd [#allocation7], 4294967040  ;;  %v345_v0 = vmov 1   ;;  %v346_v1 = vmov 3   ;;  %v59_v2 = vld [vmem:[#allocation8] sm:$0xff]  ;;  %v347_v3 = vmov 2  }
  0x3d   :  { %235 = vset.pattern.permute.xlu0 %v345_v0  ;;  %237 = vset.pattern.permute.xlu1 %v346_v1  ;;  %v348_v4 = vmov 4   ;;  %v349_v5 = vmov 5   ;;  %v350_v6 = vmov 6   ;;  %v351_v7 = vmov 7   ;;  %v54_v10 = vld [vmem:[#allocation3] sm:$0xff]  ;;  %v56_v14 = vld [vmem:[#allocation6] sm:$0xff] }
  0x3e   :  { %69 = vperm.xlu0 %235, %v59_v2   ;;  %101 = vperm.xlu1 %237, %v59_v2   ;;  %v352_v8 = vmov 0   ;;  %v353_v9 = vmov 8   ;;  %s354_s2 = smov 127   ;;  %s355_s21 = smov 126   ;;  %vm80_vm0 = vcmask 1039360   ;;  %vm96_vm1 = vcmask 1031168  }
  0x3f   :  { %s356_s22 = smov 125   ;;  %s357_s23 = smov 124   ;;  %vm112_vm2 = vcmask 1022976   ;;  %vm128_vm3 = vcmask 1014784   ;;  %vm144_vm4 = vcmask 1006592   ;;  %vm160_vm5 = vcmask 998400  }
  0x40   :  { %s358_s24 = smov 123   ;;  %s359_s25 = smov 122   ;;  %vm176_vm6 = vcmask 990208   ;;  %vm192_vm7 = vcmask 982016  }
  0x41   :  { %s360_s26 = smov 121   ;;  %s361_s27 = smov 120  }
  0x42   :  { %236 = vset.pattern.permute.xlu0 %v347_v3  ;;  %238 = vset.pattern.permute.xlu1 %v348_v4  ;;  %s362_s1 = smov [#allocation9]  }
  0x43   :  { %85 = vperm.xlu0 %236, %v59_v2   ;;  %117 = vperm.xlu1 %238, %v59_v2   ;;  %s203_s28 = sshll.u32 %s362_s1, 4  ;;  %s204_s28 = int_to_ptr.vmem [resolvable:$true] %s203_s28 }
  0x44   :  { %s314_s29 = scalar_lea.vmem %s204_s28, 128  ;;  %p319_p3 = scmp.lt.s32.totalorder %s204_s28, %s204_s28 }
  0x45   :  { %p315_p2 = scmp.ne.s32.totalorder %s204_s28, %s314_s29  ;;  %p320_p4 = scmp.lt.s32.totalorder %s314_s29, %s314_s29 }
  0x47   :  { %239 = vset.pattern.permute.xlu1 %v349_v5  ;;  %240 = vset.pattern.permute.xlu0 %v350_v6  ;;  %p321_p5 = por %p320_p4, %p319_p3 }
  0x48   :  { %133 = vperm.xlu1 %239, %v59_v2   ;;  %149 = vperm.xlu0 %240, %v59_v2  }
  0x49   :  { %p322_p6 = pnand %p321_p5, %p315_p2 }
  0x4c   :  { %241 = vset.pattern.permute.xlu1 %v351_v7  ;;  %243 = vset.pattern.permute.xlu0 %v352_v8 }
  0x4d   :  { %165 = vperm.xlu1 %241, %v59_v2   ;;  %62 = vperm.xlu0 %243, %v59_v2  }
  0x51   :  { %242 = vset.pattern.permute.xlu1 %v353_v9  ;;  %244 = vset.pattern.permute.xlu0 %v353_v9 }
  0x52   :  { %181 = vperm.xlu1 %242, %v59_v2  }
  0xbd   :  { %v70_v11 = vpop.permute.xlu0 %69  ;;  %v102_v13 = vpop.permute.xlu1 %101 }
  0xbe   :  { %v72_v12 = vmul.f32 %v70_v11, %v54_v10  ;;  %v73_v15 = vmul.f32 %v70_v11, %v56_v14  ;;  %v104_v20 = vmul.f32 %v102_v13, %v54_v10  ;;  %v105_v22 = vmul.f32 %v102_v13, %v56_v14 }
  0xc0   :  { %76 = vrot.lane.b32.xlu1 %v72_v12, %s354_s2 }
  0xc2   :  { %v86_v16 = vpop.permute.xlu0 %85  ;;  %v118_v19 = vpop.permute.xlu1 %117 }
  0xc3   :  { %v88_v17 = vmul.f32 %v86_v16, %v54_v10  ;;  %v89_v18 = vmul.f32 %v86_v16, %v56_v14  ;;  %v120_v21 = vmul.f32 %v118_v19, %v54_v10  ;;  %v121_v24 = vmul.f32 %v118_v19, %v56_v14 }
  0xc4   :  { %78 = vrot.lane.b32.xlu1 %v73_v15, %s354_s2 }
  0xc5   :  { %92 = vrot.lane.b32.xlu0 %v88_v17, %s355_s21 }
  0xc7   :  { %v134_v23 = vpop.permute.xlu1 %133  ;;  %v150_v26 = vpop.permute.xlu0 %149 }
  0xc8   :  { %94 = vrot.lane.b32.xlu1 %v89_v18, %s355_s21  ;;  %v136_v25 = vmul.f32 %v134_v23, %v54_v10  ;;  %v137_v27 = vmul.f32 %v134_v23, %v56_v14  ;;  %v152_v29 = vmul.f32 %v150_v26, %v54_v10  ;;  %v153_v30 = vmul.f32 %v150_v26, %v56_v14 }
  0xc9   :  { %108 = vrot.lane.b32.xlu0 %v104_v20, %s356_s22 }
  0xcc   :  { %110 = vrot.lane.b32.xlu1 %v105_v22, %s356_s22  ;;  %v166_v28 = vpop.permute.xlu1 %165  ;;  %v63_v36 = vpop.permute.xlu0 %62 }
  0xcd   :  { %124 = vrot.lane.b32.xlu0 %v120_v21, %s357_s23  ;;  %v168_v31 = vmul.f32 %v166_v28, %v54_v10  ;;  %v169_v33 = vmul.f32 %v166_v28, %v56_v14  ;;  %v65_v44 = vmul.f32 %v63_v36, %v54_v10 }
  0xd0   :  { %126 = vrot.lane.b32.xlu1 %v121_v24, %s357_s23 }
  0xd1   :  { %140 = vrot.lane.b32.xlu0 %v136_v25, %s358_s24  ;;  %v182_v32 = vpop.permute.xlu1 %181 }
  0xd2   :  { %v184_v34 = vmul.f32 %v182_v32, %v54_v10  ;;  %v185_v35 = vmul.f32 %v182_v32, %v56_v14 }
  0xd4   :  { %142 = vrot.lane.b32.xlu1 %v137_v27, %s358_s24 }
  0xd5   :  { %156 = vrot.lane.b32.xlu0 %v152_v29, %s359_s25 }
  0xd8   :  { %158 = vrot.lane.b32.xlu1 %v153_v30, %s359_s25 }
  0xd9   :  { %172 = vrot.lane.b32.xlu0 %v168_v31, %s360_s26 }
  0xdc   :  { %174 = vrot.lane.b32.xlu1 %v169_v33, %s360_s26 }
  0xdd   :  { %188 = vrot.lane.b32.xlu0 %v184_v34, %s361_s27 }
  0xe0   :  { %190 = vrot.lane.b32.xlu1 %v185_v35, %s361_s27 }
 0x132   :  { %v77_v37 = vpop.permute.xlu1 %76 }
 0x136   :  { %v79_v38 = vpop.permute.xlu1 %78 }
 0x137   :  { %v93_v39 = vpop.permute.xlu0 %92  ;;  %v81_v46 = vsel %vm80_vm0, %v77_v37, %v79_v38 }
 0x138   :  { %v83_v49 = vadd.f32 %v81_v46, %v65_v44 }
 0x13a   :  { %v95_v40 = vpop.permute.xlu1 %94 }
 0x13b   :  { %v109_v41 = vpop.permute.xlu0 %108  ;;  %v97_v48 = vsel %vm96_vm1, %v93_v39, %v95_v40 }
 0x13c   :  { %v99_v53 = vadd.f32 %v97_v48, %v83_v49 }
 0x13e   :  { %v111_v42 = vpop.permute.xlu1 %110 }
 0x13f   :  { %v125_v43 = vpop.permute.xlu0 %124  ;;  %v113_v51 = vsel %vm112_vm2, %v109_v41, %v111_v42 }
 0x140   :  { %v115_v55 = vadd.f32 %v113_v51, %v99_v53 }
 0x142   :  { %v127_v45 = vpop.permute.xlu1 %126 }
 0x143   :  { %v141_v47 = vpop.permute.xlu0 %140  ;;  %v129_v54 = vsel %vm128_vm3, %v125_v43, %v127_v45 }
 0x144   :  { %v131_v59 = vadd.f32 %v129_v54, %v115_v55 }
 0x146   :  { %v143_v50 = vpop.permute.xlu1 %142 }
 0x147   :  { %v157_v52 = vpop.permute.xlu0 %156  ;;  %v145_v57 = vsel %vm144_vm4, %v141_v47, %v143_v50 }
 0x148   :  { %v147_v61 = vadd.f32 %v145_v57, %v131_v59 }
 0x14a   :  { %v159_v56 = vpop.permute.xlu1 %158 }
 0x14b   :  { %v173_v58 = vpop.permute.xlu0 %172  ;;  %v161_v60 = vsel %vm160_vm5, %v157_v52, %v159_v56 }
 0x14c   :  { %v163_v0 = vadd.f32 %v161_v60, %v147_v61 }
 0x14e   :  { %v175_v62 = vpop.permute.xlu1 %174 }
 0x14f   :  { %v177_v63 = vsel %vm176_vm6, %v173_v58, %v175_v62  ;;  %v189_v1 = vpop.permute.xlu0 %188 }
 0x150   :  { %v179_v2 = vadd.f32 %v177_v63, %v163_v0 }
 0x152   :  { %v191_v3 = vpop.permute.xlu1 %190 }
 0x153   :  { %v193_v4 = vsel %vm192_vm7, %v189_v1, %v191_v3 }
 0x154   :  { %v195_v5 = vadd.f32 %v193_v4, %v179_v2 }
 0x156   :  { %196 = vst [vmem:[#allocation9] sm:$0xff] %v195_v5 }
 0x157   :  { %325 = shalt.err (!%p322_p6)
}
 0x158   :  { %s326_s5 = scalar_lea.hbm %s434_s3, 128 }
 0x159   :  { %p327_p7 = scmp.ne.s32.totalorder %s434_s3, %s326_s5  ;;  %p330_p8 = scmp.lt.u32.totalorder %s326_s5, %s434_s3 }
 0x15b   :  { %p332_p9 = pnand %p330_p8, %p327_p7 }
 0x15d   :  { %335 = shalt.err (!%p332_p9)
}
 0x15e   :  { %206 = dma.vmem_to_hbm [thread:$0]  %s204_s28, 128, %s434_s3, [#allocation5]  }
 0x15f   :  { %340 = dma.done.wait [#allocation5], 128  }
 0x160   :  { %341 = vsyncadd [#allocation5], 4294967168 }
 0x161   :  { %210 = vsyncpa [#allocation4], 1 }
 0x162   :  { %211 = vsyncpa [#allocation7], 1 }
 0x163   :  { %212 = vsyncpa [#allocation5], 1 }

</bundles_post_ra>
